<compile_context>
chip_gen: v6e
topology: v6e:2x2x1
jax: 0.10.0
libtpu: 0.0.40
codegen_flags: <defaults>
</compile_context>

<pallas_src>
import math
import functools

import jax
import jax.numpy as jnp
from jax.experimental import pallas as pl
from jax.experimental.pallas import tpu as pltpu


# ---------------------------------------------------------------------------
# In-kernel helpers (operate on VMEM-resident values)
# ---------------------------------------------------------------------------

def _layernorm(x, g, b, eps=1e-12):
    mu = jnp.mean(x, axis=-1, keepdims=True)
    var = jnp.mean(jnp.square(x - mu), axis=-1, keepdims=True)
    return (x - mu) * jax.lax.rsqrt(var + eps) * g + b


def _erf_poly(x):
    # Abramowitz & Stegun 7.1.26 polynomial erf (max abs err ~1.5e-7):
    # exact-GELU stand-in that lowers on Mosaic (exp/mul/add only).
    a1, a2, a3, a4, a5 = 0.254829592, -0.284496736, 1.421413741, -1.453152027, 1.061405429
    p = 0.3275911
    s = jnp.where(x >= 0.0, 1.0, -1.0)
    z = x * s
    t = 1.0 / (1.0 + p * z)
    poly = ((((a5 * t + a4) * t + a3) * t + a2) * t + a1) * t
    return s * (1.0 - poly * jnp.exp(-z * z))


def _gelu_exact(x):
    # TODO(synk): on v6e/v7x this polynomial could run in bf16 (bf16 VPU) to halve
    # VALU pressure; kept f32 for v5e compatibility / accuracy.
    return 0.5 * x * (1.0 + _erf_poly(x * 0.7071067811865476))


# ---------------------------------------------------------------------------
# VMEM-limit sizing (per-generation clamp via get_tpu_info)
# ---------------------------------------------------------------------------

def _clamp_vmem(want_bytes):
    cap = 64 << 20                         # conservative default (v7x physical VMEM)
    try:
        cap = int(pltpu.get_tpu_info().vmem_capacity_bytes)
    except Exception:
        pass
    lo = 16 << 20
    hi = int(cap * 0.9)                    # guard band under physical VMEM
    return max(lo, min(int(want_bytes), hi))


def _layer_vmem_bytes(N, H, nH, dh, inter):
    bf16, f32 = 2, 4
    weights = (nH * H * 3 * dh + nH * dh * H + H * inter + inter * H) * bf16
    io = 2 * 2 * N * H * bf16                       # double-buffered in/out blocks
    interm = (nH * N * H) * bf16                    # x broadcast over heads (bf16)
    interm += (nH * N * 3 * dh                      # qkv (f32)
               + 3 * nH * N * N                     # scores / exp / probs (f32)
               + nH * N * dh                        # ctx (f32)
               + nH * N * H                         # per-head out-proj products (f32)
               + 2 * N * inter                      # FFN intermediate (f32)
               + 6 * N * H) * f32                   # residuals / LN temporaries
    return int((weights + io + interm) * 1.2) + (4 << 20)


# ---------------------------------------------------------------------------
# Embedding LayerNorm: row-tiled, parallel grid, bf16 output
# ---------------------------------------------------------------------------

def _row_block(rows, cap=1024):
    if rows <= cap:
        return rows
    for d in range(cap, 0, -1):
        if rows % d == 0 and d % 8 == 0:
            return d
    return rows


def pallas_layernorm(x2d, gamma, beta, out_dtype=jnp.bfloat16):
    rows, H = x2d.shape
    block = _row_block(rows)

    def kernel(x_ref, g_ref, b_ref, o_ref):
        o_ref[...] = _layernorm(x_ref[...].astype(jnp.float32),
                                g_ref[...], b_ref[...]).astype(o_ref.dtype)

    return pl.pallas_call(
        kernel,
        out_shape=jax.ShapeDtypeStruct((rows, H), out_dtype),
        grid=(rows // block,),
        in_specs=[pl.BlockSpec((block, H), lambda i: (i, 0)),
                  pl.BlockSpec((1, H), lambda i: (0, 0)),
                  pl.BlockSpec((1, H), lambda i: (0, 0))],
        out_specs=pl.BlockSpec((block, H), lambda i: (i, 0)),
        compiler_params=pltpu.CompilerParams(
            dimension_semantics=("parallel",),
            vmem_limit_bytes=_clamp_vmem(32 << 20)),
    )(x2d, gamma, beta)


# ---------------------------------------------------------------------------
# Fused transformer layer: one pallas_call per layer, grid over sequence groups
# ---------------------------------------------------------------------------

@functools.lru_cache(maxsize=None)
def _make_layer_kernel(n_heads, d_head, bt, seq):
    H = n_heads * d_head
    N = bt * seq                                   # rows processed per grid step

    def kernel(x_ref, m_ref, wqkv_ref, bqkv_ref, wo_ref, bo_ref,
               ln1g_ref, ln1b_ref, w1_ref, b1_ref, w2_ref, b2_ref,
               ln2g_ref, ln2b_ref, o_ref):
        xb = x_ref[...]                            # (N, H) bf16
        x = xb.astype(jnp.float32)

        # ---- QKV projection, batched over heads (canonical batched matmul) ----
        # wqkv: (nH, H, 3*dh), 1/sqrt(dh) pre-folded into the Q columns host-side.
        xh = jnp.broadcast_to(xb[None], (n_heads, N, H))
        qkv = jax.lax.dot_general(
            xh, wqkv_ref[...], (((2,), (1,)), ((0,), (0,))),
            preferred_element_type=jnp.float32) + bqkv_ref[...]        # (nH, N, 3dh)
        q = qkv[:, :, :d_head].astype(jnp.bfloat16)
        k = qkv[:, :, d_head:2 * d_head].astype(jnp.bfloat16)
        v = qkv[:, :, 2 * d_head:].astype(jnp.bfloat16)

        # ---- additive bias, built once (key padding + cross-sequence block mask) ----
        keypad = m_ref[0]                                              # (1, N) f32
        if bt > 1:
            rseq = jax.lax.broadcasted_iota(jnp.int32, (N, N), 0) // seq
            cseq = jax.lax.broadcasted_iota(jnp.int32, (N, N), 1) // seq
            bias = jnp.where(rseq == cseq, 0.0, -1e9) + keypad         # (N, N)
        else:
            bias = keypad                                              # broadcasts

        # ---- attention, batched over heads (no per-head Python loop) ----
        s = jax.lax.dot_general(q, k, (((2,), (2,)), ((0,), (0,))),
                                preferred_element_type=jnp.float32)    # (nH, N, N)
        s = s + bias
        s = s - jnp.max(s, axis=-1, keepdims=True)
        e = jnp.exp(s)
        p = e * pl.reciprocal(jnp.sum(e, axis=-1, keepdims=True), approx=True)
        ctx = jax.lax.dot_general(p.astype(jnp.bfloat16), v,
                                  (((2,), (1,)), ((0,), (0,))),
                                  preferred_element_type=jnp.float32)  # (nH, N, dh)

        # ---- output projection: per-head batched matmul, then sum over heads ----
        # sum_h ctx[h] @ Wo[h] == concat_h(ctx[h]) @ Wo ; avoids a heads<->rows
        # transpose that Mosaic may not support / would pay XLU for.
        per_head = jax.lax.dot_general(ctx.astype(jnp.bfloat16), wo_ref[...],
                                       (((2,), (1,)), ((0,), (0,))),
                                       preferred_element_type=jnp.float32)
        attn_out = jnp.sum(per_head, axis=0) + bo_ref[...]             # (N, H)

        x1 = _layernorm(x + attn_out, ln1g_ref[...], ln1b_ref[...])

        # ---- FFN (bf16 matmuls, f32 GELU) + residual + LN2 ----
        # TODO(synk): for long sequences, row-tile this (N, inter) intermediate
        # (pltpu.emit_pipeline over row slabs) to bound VMEM growth on v7x.
        hdn = jnp.dot(x1.astype(jnp.bfloat16), w1_ref[...],
                      preferred_element_type=jnp.float32) + b1_ref[...]
        hdn = _gelu_exact(hdn)
        ffn_out = jnp.dot(hdn.astype(jnp.bfloat16), w2_ref[...],
                          preferred_element_type=jnp.float32) + b2_ref[...]
        x2 = _layernorm(x1 + ffn_out, ln2g_ref[...], ln2b_ref[...])

        o_ref[...] = x2.astype(o_ref.dtype)

    return kernel


_SINGLE_BUFFER_WEIGHTS = [True]      # flipped off once if Buffered(1) is rejected


def fused_bert_layer(x2d, keypad3, p, cfg, bt, seq):
    rows, H = x2d.shape
    nH = cfg["heads"]
    dh = H // nH
    inter = cfg["inter"]
    nB = rows // (bt * seq)
    kernel = _make_layer_kernel(nH, dh, bt, seq)
    vmem_bytes = _clamp_vmem(_layer_vmem_bytes(bt * seq, H, nH, dh, inter))

    def run(single_buffer):
        def const_spec(shape):
            idx = lambda b: (0,) * len(shape)
            if single_buffer:
                # grid-invariant operands: keep ONE VMEM copy instead of two
                return pl.BlockSpec(shape, idx, pipeline_mode=pl.Buffered(1))
            return pl.BlockSpec(shape, idx)

        in_specs = [
            pl.BlockSpec((bt * seq, H), lambda b: (b, 0)),      # x rows (bf16)
            pl.BlockSpec((1, 1, bt * seq), lambda b: (b, 0, 0)),  # additive key mask
            const_spec((nH, H, 3 * dh)), const_spec((nH, 1, 3 * dh)),   # wqkv, bqkv
            const_spec((nH, dh, H)), const_spec((1, H)),                # wo, bo
            const_spec((1, H)), const_spec((1, H)),                     # ln1 g/b
            const_spec((H, inter)), const_spec((1, inter)),             # w1, b1
            const_spec((inter, H)), const_spec((1, H)),                 # w2, b2
            const_spec((1, H)), const_spec((1, H)),                     # ln2 g/b
        ]
        return pl.pallas_call(
            kernel,
            out_shape=jax.ShapeDtypeStruct((rows, H), jnp.bfloat16),
            grid=(nB,),
            in_specs=in_specs,
            out_specs=pl.BlockSpec((bt * seq, H), lambda b: (b, 0)),
            compiler_params=pltpu.CompilerParams(
                dimension_semantics=("parallel",),
                vmem_limit_bytes=vmem_bytes),
        )(x2d, keypad3,
          p["wqkv"], p["bqkv"], p["wo"], p["bo"], p["ln1_g"], p["ln1_b"],
          p["w1"], p["b1"], p["w2"], p["b2"], p["ln2_g"], p["ln2_b"])

    if _SINGLE_BUFFER_WEIGHTS[0]:
        try:
            return run(True)
        except Exception:
            _SINGLE_BUFFER_WEIGHTS[0] = False     # this JAX build rejects Buffered(1)
    return run(False)


# ---------------------------------------------------------------------------
# Strip [CLS]/[SEP] + re-pad + dropout(identity) + classifier, fused.
# Input is pre-trimmed to rows [1, 1+new_max); output is lane-dense (128 labels).
# ---------------------------------------------------------------------------

def pallas_strip_pad_classify(x_trim, lengths, w_pad, b_pad):
    B, NM, H = x_trim.shape
    Np = w_pad.shape[1]          # 128 (lane-dense)

    def kernel(len_ref, x_ref, w_ref, b_ref, o_ref):
        b = pl.program_id(0)
        n_valid = len_ref[b] - 2                      # tokens kept per sentence
        row = jax.lax.broadcasted_iota(jnp.int32, (NM, 1), 0)
        x = jnp.where(row < n_valid, x_ref[0], 0).astype(jnp.bfloat16)
        # TODO(synk): nn.Dropout(hidden_dropout_prob) is identity at inference.
        o_ref[0] = (jnp.dot(x, w_ref[...], preferred_element_type=jnp.float32)
                    + b_ref[...]).astype(o_ref.dtype)

    grid_spec = pltpu.PrefetchScalarGridSpec(
        num_scalar_prefetch=1,
        grid=(B,),
        in_specs=[
            pl.BlockSpec((1, NM, H), lambda b, lens: (b, 0, 0)),
            pl.BlockSpec((H, Np), lambda b, lens: (0, 0)),
            pl.BlockSpec((1, Np), lambda b, lens: (0, 0)),
        ],
        out_specs=pl.BlockSpec((1, NM, Np), lambda b, lens: (b, 0, 0)),
    )
    return pl.pallas_call(
        kernel,
        out_shape=jax.ShapeDtypeStruct((B, NM, Np), jnp.float32),
        grid_spec=grid_spec,
        compiler_params=pltpu.CompilerParams(
            dimension_semantics=("parallel",),
            vmem_limit_bytes=_clamp_vmem(32 << 20)),
    )(lengths, x_trim, w_pad, b_pad)


# ---------------------------------------------------------------------------
# Mini-BERT + NER head forward
# ---------------------------------------------------------------------------

def _pick_bt(batch, seq):
    """Sequences packed per grid step: fill >=128 rows when possible, but keep
    >=2 grid steps so both v7x TensorCores get work."""
    target = max(1, pl.cdiv(128, seq))
    bt = 1
    for cand in range(1, batch + 1):
        if batch % cand == 0 and cand <= target:
            bt = cand
    while bt > 1 and batch // bt < 2:
        bt -= 1
        while bt > 1 and batch % bt:
            bt -= 1
    return max(1, bt)


def bert_ner_forward(params, input_ids, lengths_list, cfg):
    B, S = input_ids.shape
    H = cfg["hidden"]
    lengths = jnp.asarray(lengths_list, dtype=jnp.int32)

    # --- embeddings (gathers are XLA glue) + row-tiled Pallas LayerNorm -> bf16 ---
    x = (params["word_emb"][input_ids]
         + params["pos_emb"][:S][None, :, :]
         + params["type_emb"][0][None, None, :])
    x2d = pallas_layernorm(x.reshape(B * S, H),
                           params["emb_ln_g"], params["emb_ln_b"])     # (B*S, H) bf16

    # --- additive key-padding mask, pre-shaped for the per-grid-step block ---
    bt = _pick_bt(B, S)
    keypad = jnp.where(jnp.arange(S)[None, :] < lengths[:, None], 0.0, -1e9)
    keypad3 = keypad.astype(jnp.float32).reshape(B // bt, 1, bt * S)

    # --- transformer encoder: one fused pallas_call per layer ---
    for layer_p in params["layers"]:
        x2d = fused_bert_layer(x2d, keypad3, layer_p, cfg, bt, S)

    # --- strip [CLS]/[SEP], pad, dropout(identity), classifier (fused) ---
    new_max = int(max(lengths_list)) - 2          # host-known; no device sync
    x_trim = x2d.reshape(B, S, H)[:, 1:1 + new_max, :]
    logits_padded = pallas_strip_pad_classify(
        x_trim, lengths, params["cls_w_pad"], params["cls_b_pad"])
    return logits_padded[:, :, :cfg["labels"]]


# ---------------------------------------------------------------------------
# Deterministic synthetic parameter initialization (fused / pre-cast layout)
# ---------------------------------------------------------------------------

def init_params(key, cfg):
    H, inter, L = cfg["hidden"], cfg["inter"], cfg["labels"]
    V, nL, nH = cfg["vocab"], cfg["layers"], cfg["heads"]
    dh = H // nH
    LP = 128   # lane-dense classifier output width
    ks = iter(jax.random.split(key, 8 + 8 * nL))

    def w(shape):
        return 0.02 * jax.random.normal(next(ks), shape, jnp.float32)

    def heads_cols(m):   # (H, H) -> (nH, H, dh): group output columns per head
        return jnp.transpose(m.reshape(H, nH, dh), (1, 0, 2))

    cls_w = w((H, L))
    params = dict(
        word_emb=w((V, H)),
        pos_emb=w((cfg["max_pos"], H)),
        type_emb=w((2, H)),
        emb_ln_g=jnp.ones((1, H), jnp.float32),
        emb_ln_b=jnp.zeros((1, H), jnp.float32),
        cls_w_pad=jnp.pad(cls_w, ((0, 0), (0, LP - L))).astype(jnp.bfloat16),
        cls_b_pad=jnp.zeros((1, LP), jnp.float32),
        layers=[],
    )
    scale = 1.0 / math.sqrt(dh)
    for _ in range(nL):
        wq, wk, wv = w((H, H)), w((H, H)), w((H, H))
        # 1/sqrt(dh) folded into Q columns; weights stored per-head, pre-cast bf16
        wqkv = jnp.concatenate(
            [heads_cols(wq) * scale, heads_cols(wk), heads_cols(wv)], axis=-1)
        params["layers"].append(dict(
            wqkv=wqkv.astype(jnp.bfloat16),                       # (nH, H, 3dh)
            bqkv=jnp.zeros((nH, 1, 3 * dh), jnp.float32),
            wo=w((H, H)).reshape(nH, dh, H).astype(jnp.bfloat16),  # rows per head
            bo=jnp.zeros((1, H), jnp.float32),
            ln1_g=jnp.ones((1, H), jnp.float32), ln1_b=jnp.zeros((1, H), jnp.float32),
            w1=w((H, inter)).astype(jnp.bfloat16), b1=jnp.zeros((1, inter), jnp.float32),
            w2=w((inter, H)).astype(jnp.bfloat16), b2=jnp.zeros((1, H), jnp.float32),
            ln2_g=jnp.ones((1, H), jnp.float32), ln2_b=jnp.zeros((1, H), jnp.float32),
        ))
    return params


# ---------------------------------------------------------------------------

if __name__ == "__main__":
    cfg = dict(vocab=100, hidden=32, heads=4, layers=2, inter=64,
               max_pos=16, labels=5)
    B = 2
    lengths_list = [8, 6]
    max_len = max(lengths_list)

    key = jax.random.PRNGKey(0)
    k_ids, k_params = jax.random.split(key)
    input_ids = jax.random.randint(k_ids, (B, max_len), 0, cfg["vocab"],
                                   dtype=jnp.int32)
    params = init_params(k_params, cfg)

    logits = bert_ner_forward(params, input_ids, lengths_list, cfg)
    jax.block_until_ready(logits)

    assert logits.shape == (B, max_len - 2, cfg["labels"])
    assert bool(jnp.all(jnp.isfinite(logits)))
    print("KERNEL_OK")
</pallas_src>

<mosaic_0001>
module attributes {stable_mosaic.version = 11 : i64} {
  func.func @kernel(%arg0: i32, %arg1: memref<16x32xf32, #tpu.memory_space<vmem>>, %arg2: memref<1x32xf32, #tpu.memory_space<vmem>>, %arg3: memref<1x32xf32, #tpu.memory_space<vmem>>, %arg4: memref<16x32xbf16, #tpu.memory_space<vmem>>) attributes {dimension_semantics = [#tpu.dimension_semantics<parallel>], iteration_bounds = array<i64: 1>, scalar_prefetch = 0 : i64, scratch_operands = 0 : i64, tpu.core_type = #tpu.core_type<tc>, window_params = [{transform_indices = @transform_0, window_bounds = array<i64: 16, 32>}, {pipeline_mode = #tpu.pipeline_mode<synchronous>, transform_indices = @transform_1, window_bounds = array<i64: 1, 32>}, {pipeline_mode = #tpu.pipeline_mode<synchronous>, transform_indices = @transform_2, window_bounds = array<i64: 1, 32>}, {transform_indices = @transform_3, window_bounds = array<i64: 16, 32>}]} {
    %c0 = arith.constant 0 : index
    %c0_0 = arith.constant 0 : index
    %0 = vector.load %arg1[%c0, %c0_0] : memref<16x32xf32, #tpu.memory_space<vmem>>, vector<16x32xf32>
    %c0_1 = arith.constant 0 : index
    %c0_2 = arith.constant 0 : index
    %1 = vector.load %arg2[%c0_1, %c0_2] : memref<1x32xf32, #tpu.memory_space<vmem>>, vector<1x32xf32>
    %c0_3 = arith.constant 0 : index
    %c0_4 = arith.constant 0 : index
    %2 = vector.load %arg3[%c0_3, %c0_4] : memref<1x32xf32, #tpu.memory_space<vmem>>, vector<1x32xf32>
    %cst = arith.constant dense<0.000000e+00> : vector<16xf32>
    %3 = vector.multi_reduction <add>, %0, %cst [1] : vector<16x32xf32> to vector<16xf32>
    %4 = vector.shape_cast %3 : vector<16xf32> to vector<16x1xf32>
    %cst_5 = arith.constant 3.200000e+01 : f32
    %5 = vector.broadcast %cst_5 : f32 to vector<16x1xf32>
    %6 = arith.divf %4, %5 : vector<16x1xf32>
    %7 = vector.broadcast %6 : vector<16x1xf32> to vector<16x32xf32>
    %8 = arith.subf %0, %7 : vector<16x32xf32>
    %9 = arith.mulf %8, %8 : vector<16x32xf32>
    %cst_6 = arith.constant dense<0.000000e+00> : vector<16xf32>
    %10 = vector.multi_reduction <add>, %9, %cst_6 [1] : vector<16x32xf32> to vector<16xf32>
    %11 = vector.shape_cast %10 : vector<16xf32> to vector<16x1xf32>
    %cst_7 = arith.constant 3.200000e+01 : f32
    %12 = vector.broadcast %cst_7 : f32 to vector<16x1xf32>
    %13 = arith.divf %11, %12 : vector<16x1xf32>
    %14 = vector.broadcast %6 : vector<16x1xf32> to vector<16x32xf32>
    %15 = arith.subf %0, %14 : vector<16x32xf32>
    %cst_8 = arith.constant 9.99999996E-13 : f32
    %16 = vector.broadcast %cst_8 : f32 to vector<16x1xf32>
    %17 = arith.addf %13, %16 : vector<16x1xf32>
    %18 = math.rsqrt %17 : vector<16x1xf32>
    %19 = vector.broadcast %18 : vector<16x1xf32> to vector<16x32xf32>
    %20 = arith.mulf %15, %19 : vector<16x32xf32>
    %21 = vector.broadcast %1 : vector<1x32xf32> to vector<16x32xf32>
    %22 = arith.mulf %20, %21 : vector<16x32xf32>
    %23 = vector.broadcast %2 : vector<1x32xf32> to vector<16x32xf32>
    %24 = arith.addf %22, %23 : vector<16x32xf32>
    %25 = arith.truncf %24 : vector<16x32xf32> to vector<16x32xbf16>
    %c0_9 = arith.constant 0 : index
    %c0_10 = arith.constant 0 : index
    %26 = vector.load %arg4[%c0_9, %c0_10] : memref<16x32xbf16, #tpu.memory_space<vmem>>, vector<16x32xbf16>
    tpu.vector_store %arg4[%c0_9, %c0_10], %25 {strides = array<i32>} : memref<16x32xbf16, #tpu.memory_space<vmem>>, vector<16x32xbf16>,
    return
  }
  func.func @transform_0(%arg0: i32) -> (i32, i32) {
    %c0_i32 = arith.constant 0 : i32
    %c0_i32_0 = arith.constant 0 : i32
    return %arg0, %c0_i32 : i32, i32
  }
  func.func @transform_1(%arg0: i32) -> (i32, i32) {
    %c0_i32 = arith.constant 0 : i32
    %c0_i32_0 = arith.constant 0 : i32
    %c0_i32_1 = arith.constant 0 : i32
    return %c0_i32, %c0_i32_0 : i32, i32
  }
  func.func @transform_2(%arg0: i32) -> (i32, i32) {
    %c0_i32 = arith.constant 0 : i32
    %c0_i32_0 = arith.constant 0 : i32
    %c0_i32_1 = arith.constant 0 : i32
    return %c0_i32, %c0_i32_0 : i32, i32
  }
  func.func @transform_3(%arg0: i32) -> (i32, i32) {
    %c0_i32 = arith.constant 0 : i32
    %c0_i32_0 = arith.constant 0 : i32
    return %arg0, %c0_i32 : i32, i32
  }
}

</mosaic_0001>

<bundles_post_ra>
// kernel: tpu_custom_call.1
= control target key start
LH: loop header
LB: loop body
LE: loop exit
PB: predicated region body
PF: predicated region fallthrough
CT: control target
= control target key end

     0   :  { %8 = vsyncpa [#allocation3], 0  ;;  %s207_s0 = inlined_call_operand.hbm [shape: f32[16,32], index: 0, kind: input, shape index: {}]   ;;  %s208_s1 = inlined_call_operand.vmem [shape: f32[1,32], index: 1, kind: input, shape index: {}]   ;;  %s209_s2 = inlined_call_operand.vmem [shape: f32[1,32], index: 2, kind: input, shape index: {}]   ;;  %s210_s3 = inlined_call_operand.hbm [shape: bf16[16,32], index: 3, kind: output, shape index: {}]  }
   0x1   :  { %9 = vsyncpa [#allocation4], 0  ;;  %s165_s12 = smov [#allocation2]  }
   0x2   :  { %s15_s13 = sshll.u32 %s165_s12, 4  ;;  %s16_s13 = int_to_ptr.vmem [resolvable:$true] %s15_s13 }
   0x3   :  { %s129_s14 = scalar_lea.vmem %s16_s13, 256  ;;  %p134_p1 = scmp.lt.s32.totalorder %s16_s13, %s16_s13 }
   0x4   :  { %p130_p0 = scmp.ne.s32.totalorder %s16_s13, %s129_s14  ;;  %p135_p2 = scmp.lt.s32.totalorder %s129_s14, %s129_s14 }
   0x6   :  { %p136_p3 = por %p135_p2, %p134_p1 }
   0x8   :  { %p137_p4 = pnand %p136_p3, %p130_p0 }
   0xa   :  { %140 = shalt.err (!%p137_p4)
}
   0xb   :  { %s166_s15 = smov 128   ;;  %s167_s16 = smov 8  }
   0xc   :  { %21 = dma.hbm_to_vmem [thread:$0]  %s207_s0, 256, %s16_s13, [#allocation3], %s166_s15, %s166_s15, %s167_s16  }
   0xd   :  { %161 = dma.done.wait [#allocation3], 256  }
   0xe   :  { %162 = vsyncadd [#allocation3], 4294967040  ;;  %vm33_vm0 = vcmask 261120   ;;  %v29_v0 = vld [vmem:[#allocation2] sm:$0xff]  ;;  %v30_v1 = vld [vmem:[#allocation2 + $0x8] sm:$0xff]  ;;  %vm85_vm1 = vcmask 257024  }
   0xf   :  { %v34_v2 = vsel %vm33_vm0, %v29_v0, 0.0  ;;  %v37_v3 = vsel %vm33_vm0, %v30_v1, 0.0  ;;  %v105_v21 = vld [vmem:[%s208_s1] ss:$0 sm:$0xff]  ;;  %s168_s22 = smov [#allocation5]  }
  0x10   :  { %35 = vadd.xlane.f32.xlu0 %v34_v2  ;;  %v106_v23 = vld [vmem:[%s209_s2] ss:$0 sm:$0xff]  ;;  %s93_s23 = sshll.u32 %s168_s22, 4  ;;  %s94_s23 = int_to_ptr.vmem [resolvable:$true] %s93_s23 }
  0x11   :  { %s141_s1 = scalar_lea.vmem %s94_s23, 128  ;;  %p146_p6 = scmp.lt.s32.totalorder %s94_s23, %s94_s23 }
  0x12   :  { %p142_p5 = scmp.ne.s32.totalorder %s94_s23, %s141_s1  ;;  %p147_p7 = scmp.lt.s32.totalorder %s141_s1, %s141_s1 }
  0x14   :  { %38 = vadd.xlane.f32.xlu0 %v37_v3  ;;  %p148_p8 = por %p147_p7, %p146_p6 }
  0x16   :  { %p149_p9 = pnand %p148_p8, %p142_p5 }
  0x99   :  { %v36_v4 = vpop.xlane.xlu0 %35 }
  0x9a   :  { %v41_v5 = vmul.f32 0.03125, %v36_v4 }
  0x9c   :  { %v43_v6 = vsub.f32 %v29_v0, %v41_v5 }
  0x9d   :  { %v39_v7 = vpop.xlane.xlu0 %38 }
  0x9e   :  { %v42_v8 = vmul.f32 0.03125, %v39_v7  ;;  %v45_v9 = vmul.f32 %v43_v6, %v43_v6 }
  0xa0   :  { %v44_v10 = vsub.f32 %v30_v1, %v42_v8  ;;  %v47_v11 = vsel %vm33_vm0, %v45_v9, 0.0 }
  0xa1   :  { %48 = vadd.xlane.f32.xlu1 %v47_v11 }
  0xa2   :  { %v46_v12 = vmul.f32 %v44_v10, %v44_v10 }
  0xa4   :  { %v50_v13 = vsel %vm33_vm0, %v46_v12, 0.0 }
  0xa5   :  { %51 = vadd.xlane.f32.xlu1 %v50_v13 }
 0x12a   :  { %v49_v14 = vpop.xlane.xlu1 %48 }
 0x12b   :  { %v53_v15 = vmul.f32 0.03125, %v49_v14 }
 0x12d   :  { %v55_v16 = vadd.f32 1e-12, %v53_v15 }
 0x12e   :  { %v52_v17 = vpop.xlane.xlu1 %51 }
 0x12f   :  { %117 = vrsqrt.f32 %v55_v16  ;;  %v54_v18 = vmul.f32 0.03125, %v52_v17 }
 0x131   :  { %v56_v19 = vadd.f32 1e-12, %v54_v18 }
 0x133   :  { %119 = vrsqrt.f32 %v56_v19 }
 0x13c   :  { %v118_v20 = vpop.eup %117 }
 0x13d   :  { %v59_v22 = vmul.f32 %v118_v20, %v43_v6 }
 0x13f   :  { %v67_v24 = vmul.f32 %v105_v21, %v59_v22 }
 0x140   :  { %v120_v25 = vpop.eup %119 }
 0x141   :  { %v60_v26 = vmul.f32 %v120_v25, %v44_v10  ;;  %v75_v27 = vadd.f32 %v106_v23, %v67_v24 }
 0x143   :  { %v68_v28 = vmul.f32 %v105_v21, %v60_v26  ;;  %v109_v29 = vpack.c.bf16 %v75_v27, %v75_v27 }
 0x145   :  { %v76_v30 = vadd.f32 %v106_v23, %v68_v28  ;;  %86 = vst.msk [vmem:[#allocation5] sm:$0xf] %vm85_vm1, %v109_v29 }
 0x147   :  { %v110_v31 = vpack.c.bf16 %v76_v30, %v76_v30 }
 0x149   :  { %87 = vst.msk [vmem:[#allocation5 + $0x4] sm:$0xf] %vm85_vm1, %v110_v31 }
 0x14a   :  { %152 = shalt.err (!%p149_p9)
}
 0x14b   :  { %s169_s2 = smov 64   ;;  %s170_s24 = smov 4  }
 0x14c   :  { %99 = dma.vmem_to_hbm [thread:$0]  %s94_s23, 128, %s210_s3, [#allocation4], %s169_s2, %s169_s2, %s170_s24  }
 0x14d   :  { %163 = dma.done.wait [#allocation4], 128  }
 0x14e   :  { %164 = vsyncadd [#allocation4], 4294967168 }
 0x14f   :  { %103 = vsyncpa [#allocation3], 1 }
 0x150   :  { %104 = vsyncpa [#allocation4], 1 }

</bundles_post_ra>
